<compile_context>
chip_gen: v6e
topology: v6e:2x2x1
jax: 0.10.0
libtpu: 0.0.40
codegen_flags: <defaults>
</compile_context>

<pallas_src>
import functools

import jax
import jax.numpy as jnp
from jax.experimental import pallas as pl
from jax.experimental.pallas import tpu as pltpu

_LANES = 512                        # lane-dense last dim (multiple of 128 and of 4)
_MIN_KERNEL_BYTES = 2 * 1024 * 1024  # below this, a fused XLA broadcast-mul wins


def _node_bridge_kernel(x_ref, w_ref, o_ref):
    # x_ref: (block_rows, L) tile; w_ref: (1, L) resident repeated-weight row.
    # Sublane-broadcast multiply on the VPU; lane-dense so stores are unmasked.
    o_ref[...] = x_ref[...] * w_ref[...]


def _default_rows_for_device():
    """(row tile, use CORE_PARALLEL) picked from the local TPU generation."""
    try:
        kind = jax.devices()[0].device_kind.lower()
    except Exception:  # no devices / CPU fallback during tracing
        kind = ""
    if "v7" in kind:
        return 4096, True      # 8 MiB f32 blocks; split row tiles across 2 TCs
    if "v6" in kind:
        return 2048, False     # 4 MiB f32 blocks
    return 1024, False         # v5e & unknown: 2 MiB blocks, safe for 16 MiB scoped VMEM


def node_bridge_forward(x, weights, *, tm=None, lanes=_LANES,
                        min_kernel_bytes=_MIN_KERNEL_BYTES, donate_input=False):
    """x: (..., 4); weights: (4,) — one scalar per nn.Linear(1, 1, bias=False)."""
    assert x.shape[-1] == 4
    assert lanes % 128 == 0 and lanes % 4 == 0
    w = weights.astype(x.dtype).reshape(4)

    t = x.size
    itemsize = x.dtype.itemsize
    t_main = (t // lanes) * lanes      # lanes-aligned prefix handled by the kernel
    tail = t - t_main                  # < lanes elements, always a multiple of 4

    # Small inputs (or nothing aligned to a lane row): launch + per-step
    # overhead dwarfs the work — let XLA's fused broadcast-mul handle it.
    if t * itemsize <= min_kernel_bytes or t_main == 0:
        return x * w

    auto_tm, core_parallel = _default_rows_for_device()
    if tm is None:
        tm = auto_tm
    # Sublane-granular row tile (f32: 8, bf16: 16, int8/fp8: 32).
    sub = {4: 8, 2: 16, 1: 32}.get(itemsize, 8)
    tm = max(sub, (int(tm) // sub) * sub)

    # Row-major flatten; channel index == flat_idx % 4.
    x_flat = x.reshape(-1)
    x2d = (x_flat[:t_main] if tail else x_flat).reshape(t_main // lanes, lanes)
    m = t_main // lanes

    # [w0 w1 w2 w3 w0 ...]: lanes % 4 == 0 keeps the pattern phase-aligned on
    # every row of the flattened view.
    w_row = jnp.tile(w, lanes // 4).reshape(1, lanes)

    # Partial edge row-blocks are masked by Pallas, so no row padding is needed.
    block_rows = m if m <= tm else tm
    grid_rows = pl.cdiv(m, block_rows)

    # in + out, double buffered, plus the weight row and headroom.
    block_bytes = block_rows * lanes * itemsize
    vmem_limit = int(min(4 * block_bytes + (4 << 20), 48 << 20))

    semantics = ((pltpu.CORE_PARALLEL,)
                 if (core_parallel and grid_rows >= 2) else (pltpu.PARALLEL,))

    io_alias = {0: 0} if (donate_input and not tail) else {}

    out2d = pl.pallas_call(
        _node_bridge_kernel,
        out_shape=jax.ShapeDtypeStruct((m, lanes), x.dtype),
        grid=(grid_rows,),
        in_specs=[
            pl.BlockSpec((block_rows, lanes), lambda i: (i, 0)),
            pl.BlockSpec((1, lanes), lambda i: (0, 0)),   # weights stay resident
        ],
        out_specs=pl.BlockSpec((block_rows, lanes), lambda i: (i, 0)),
        input_output_aliases=io_alias,
        compiler_params=pltpu.CompilerParams(
            dimension_semantics=semantics,
            vmem_limit_bytes=vmem_limit,
            # Fuse the prefix slice into the input DMA instead of materializing.
            allow_input_fusion=[0] if tail else None,
        ),
    )(x2d, w_row)

    out_main = out2d.reshape(-1)
    if tail:
        # Tiny leftover (< lanes elements): plain XLA per-channel multiply.
        tail_out = (x_flat[t_main:].reshape(-1, 4) * w).reshape(-1)
        out_flat = jnp.concatenate([out_main, tail_out])
    else:
        out_flat = out_main
    return out_flat.reshape(x.shape)


def _reference_forward(x, weights):
    # Mirrors the PyTorch module exactly: chunk -> per-channel 1x1 linear -> concat.
    chunks = [x[..., i:i + 1] * weights[i] for i in range(4)]
    return jnp.concatenate(chunks, axis=-1)


if __name__ == "__main__":
    key = jax.random.PRNGKey(0)
    kx0, kx1, kx2, kw = jax.random.split(key, 4)

    # Per-channel weights (4 x nn.Linear(1, 1, bias=False) -> 4 scalars).
    weights = jax.random.uniform(kw, (4,), dtype=jnp.float32, minval=-1.0, maxval=1.0)

    # 1) Tiny input -> default fast path (fused XLA broadcast-mul).
    x_small = jax.random.normal(kx0, (2, 8, 4), dtype=jnp.float32)
    out_small = jax.block_until_ready(node_bridge_forward(x_small, weights))
    assert out_small.shape == x_small.shape
    assert jnp.allclose(out_small, _reference_forward(x_small, weights), atol=1e-6, rtol=1e-6)

    # 2) Kernel path (forced with min_kernel_bytes=0), aligned, under jit.
    x_med = jax.random.normal(kx1, (2, 16, 32, 4), dtype=jnp.float32)  # 4096 = 8 * 512 elems
    fwd = jax.jit(functools.partial(node_bridge_forward, min_kernel_bytes=0))
    out_med = jax.block_until_ready(fwd(x_med, weights))
    assert out_med.shape == x_med.shape
    assert jnp.allclose(out_med, _reference_forward(x_med, weights), atol=1e-6, rtol=1e-6)

    # 3) Kernel path with a misaligned size: multi-step grid with a masked edge
    #    row-block plus the XLA tail path (no pad / slice of the full tensor).
    x_odd = jax.random.normal(kx2, (2, 73, 61, 4), dtype=jnp.float32)  # 35624 elems
    out_odd = jax.block_until_ready(
        node_bridge_forward(x_odd, weights, tm=16, min_kernel_bytes=0))
    assert out_odd.shape == x_odd.shape
    assert jnp.allclose(out_odd, _reference_forward(x_odd, weights), atol=1e-6, rtol=1e-6)

    print("KERNEL_OK")
</pallas_src>

<mosaic_0001>
module attributes {stable_mosaic.version = 11 : i64} {
  func.func @_node_bridge_kernel(%arg0: i32, %arg1: memref<8x512xf32, #tpu.memory_space<vmem>>, %arg2: memref<1x512xf32, #tpu.memory_space<vmem>>, %arg3: memref<8x512xf32, #tpu.memory_space<vmem>>) attributes {dimension_semantics = [#tpu.dimension_semantics<parallel>], iteration_bounds = array<i64: 1>, scalar_prefetch = 0 : i64, scratch_operands = 0 : i64, tpu.core_type = #tpu.core_type<tc>, window_params = [{transform_indices = @transform_0, window_bounds = array<i64: 8, 512>}, {pipeline_mode = #tpu.pipeline_mode<synchronous>, transform_indices = @transform_1, window_bounds = array<i64: 1, 512>}, {transform_indices = @transform_2, window_bounds = array<i64: 8, 512>}]} {
    %c0 = arith.constant 0 : index
    %c0_0 = arith.constant 0 : index
    %0 = vector.load %arg1[%c0, %c0_0] : memref<8x512xf32, #tpu.memory_space<vmem>>, vector<8x512xf32>
    %c0_1 = arith.constant 0 : index
    %c0_2 = arith.constant 0 : index
    %1 = vector.load %arg2[%c0_1, %c0_2] : memref<1x512xf32, #tpu.memory_space<vmem>>, vector<1x512xf32>
    %2 = vector.broadcast %1 : vector<1x512xf32> to vector<8x512xf32>
    %3 = arith.mulf %0, %2 : vector<8x512xf32>
    %c0_3 = arith.constant 0 : index
    %c0_4 = arith.constant 0 : index
    %4 = vector.load %arg3[%c0_3, %c0_4] : memref<8x512xf32, #tpu.memory_space<vmem>>, vector<8x512xf32>
    tpu.vector_store %arg3[%c0_3, %c0_4], %3 {strides = array<i32>} : memref<8x512xf32, #tpu.memory_space<vmem>>, vector<8x512xf32>,
    return
  }
  func.func @transform_0(%arg0: i32) -> (i32, i32) {
    %c0_i32 = arith.constant 0 : i32
    %c0_i32_0 = arith.constant 0 : i32
    return %arg0, %c0_i32 : i32, i32
  }
  func.func @transform_1(%arg0: i32) -> (i32, i32) {
    %c0_i32 = arith.constant 0 : i32
    %c0_i32_0 = arith.constant 0 : i32
    %c0_i32_1 = arith.constant 0 : i32
    return %c0_i32, %c0_i32_0 : i32, i32
  }
  func.func @transform_2(%arg0: i32) -> (i32, i32) {
    %c0_i32 = arith.constant 0 : i32
    %c0_i32_0 = arith.constant 0 : i32
    return %arg0, %c0_i32 : i32, i32
  }
}

</mosaic_0001>

<bundles_post_ra>
// kernel: tile.8
= control target key start
LH: loop header
LB: loop body
LE: loop exit
PB: predicated region body
PF: predicated region fallthrough
CT: control target
= control target key end

     0   :  { %s112_s0 = inlined_call_operand.vmem [shape: f32[4], index: 0, kind: input, shape index: {}]   ;;  %s113_s1 = inlined_call_operand.vmem [shape: f32[128,4], index: 1, kind: output, shape index: {}]  }
   0x1   :  { %v4_v0 = vld [vmem:[%s112_s0] ss:$0 sm:$0xff] }
   0x2   :  { %5 = vst [vmem:[%s113_s1] sm:$0xff] %v4_v0  ;;  %36 = vst [vmem:[%s113_s1 + $0x8] sm:$0xff] %v4_v0 }
   0x3   :  { %37 = vst [vmem:[%s113_s1 + $0x10] sm:$0xff] %v4_v0  ;;  %38 = vst [vmem:[%s113_s1 + $0x18] sm:$0xff] %v4_v0 }
   0x4   :  { %39 = vst [vmem:[%s113_s1 + $0x20] sm:$0xff] %v4_v0  ;;  %40 = vst [vmem:[%s113_s1 + $0x28] sm:$0xff] %v4_v0 }
   0x5   :  { %41 = vst [vmem:[%s113_s1 + $0x30] sm:$0xff] %v4_v0  ;;  %42 = vst [vmem:[%s113_s1 + $0x38] sm:$0xff] %v4_v0 }
   0x6   :  { %43 = vst [vmem:[%s113_s1 + $0x40] sm:$0xff] %v4_v0  ;;  %44 = vst [vmem:[%s113_s1 + $0x48] sm:$0xff] %v4_v0 }
   0x7   :  { %45 = vst [vmem:[%s113_s1 + $0x50] sm:$0xff] %v4_v0  ;;  %46 = vst [vmem:[%s113_s1 + $0x58] sm:$0xff] %v4_v0 }
   0x8   :  { %47 = vst [vmem:[%s113_s1 + $0x60] sm:$0xff] %v4_v0  ;;  %48 = vst [vmem:[%s113_s1 + $0x68] sm:$0xff] %v4_v0 }
   0x9   :  { %49 = vst [vmem:[%s113_s1 + $0x70] sm:$0xff] %v4_v0  ;;  %50 = vst [vmem:[%s113_s1 + $0x78] sm:$0xff] %v4_v0 }

// kernel: tile.9
= control target key start
LH: loop header
LB: loop body
LE: loop exit
PB: predicated region body
PF: predicated region fallthrough
CT: control target
= control target key end

     0   :  { %vm5_vm0 = vcmask 1041409   ;;  %vm9_vm1 = vcmask 1042434   ;;  %vm13_vm2 = vcmask 1043459   ;;  %s766_s30 = smov 124   ;;  %s767_s8 = smov 116   ;;  %vm15_vm3 = vcmask 31744   ;;  %s1300_s0 = inlined_call_operand.vmem [shape: f32[128,4], index: 0, kind: input, shape index: {}]   ;;  %s1301_s1 = inlined_call_operand.vmem [shape: f32[1,512], index: 1, kind: output, shape index: {}]  }
   0x1   :  { %v608_v0 = vld [vmem:[%s1300_s0 + $0x1f] sm:$0x1]   ;;  %v616_v5 = vld [vmem:[%s1300_s0 + $0x1d] sm:$0x1]   ;;  %v612_v11 = vld [vmem:[%s1300_s0 + $0x1e] sm:$0x1]  }
   0x2   :  { %v609_v1 = vld [vmem:[%s1300_s0 + $0x3e] sm:$0x2]   ;;  %v617_v6 = vld [vmem:[%s1300_s0 + $0x3c] sm:$0x2]   ;;  %v613_v14 = vld [vmem:[%s1300_s0 + $0x3d] sm:$0x2]  }
   0x3   :  { %v610_v2 = vld [vmem:[%s1300_s0 + $0x5d] sm:$0x4]   ;;  %v22_v4 = vsel %vm5_vm0, %v609_v1, %v608_v0  ;;  %v618_v7 = vld [vmem:[%s1300_s0 + $0x5b] sm:$0x4]   ;;  %v58_v9 = vsel %vm5_vm0, %v617_v6, %v616_v5  ;;  %v614_v15 = vld [vmem:[%s1300_s0 + $0x5c] sm:$0x4]   ;;  %v40_v18 = vsel %vm5_vm0, %v613_v14, %v612_v11 }
   0x4   :  { %v611_v3 = vld [vmem:[%s1300_s0 + $0x7c] sm:$0x8]   ;;  %v26_v8 = vsel %vm9_vm1, %v610_v2, %v22_v4  ;;  %v619_v10 = vld [vmem:[%s1300_s0 + $0x7a] sm:$0x8]   ;;  %v62_v13 = vsel %vm9_vm1, %v618_v7, %v58_v9  ;;  %v615_v16 = vld [vmem:[%s1300_s0 + $0x7b] sm:$0x8]   ;;  %v44_v22 = vsel %vm9_vm1, %v614_v15, %v40_v18 }
   0x5   :  { %v30_v12 = vsel %vm13_vm2, %v611_v3, %v26_v8  ;;  %v66_v17 = vsel %vm13_vm2, %v619_v10, %v62_v13  ;;  %v620_v19 = vld [vmem:[%s1300_s0 + $0x1c] sm:$0x1]   ;;  %v624_v25 = vld [vmem:[%s1300_s0 + $0x1b] sm:$0x1]   ;;  %v48_v26 = vsel %vm13_vm2, %v615_v16, %v44_v22  ;;  %v628_v33 = vld [vmem:[%s1300_s0 + $0x1a] sm:$0x1]  }
   0x6   :  { %31 = vrot.lane.b32.xlu0 %v30_v12, %s766_s30  ;;  %v621_v20 = vld [vmem:[%s1300_s0 + $0x3b] sm:$0x2]   ;;  %67 = vrot.lane.b32.xlu1 %v66_v17, %s767_s8  ;;  %v625_v28 = vld [vmem:[%s1300_s0 + $0x3a] sm:$0x2]   ;;  %s768_s25 = smov 120   ;;  %s769_s30 = smov 112  }
   0x7   :  { %v622_v21 = vld [vmem:[%s1300_s0 + $0x5a] sm:$0x4]   ;;  %v76_v23 = vsel %vm5_vm0, %v621_v20, %v620_v19  ;;  %v626_v29 = vld [vmem:[%s1300_s0 + $0x59] sm:$0x4]   ;;  %v94_v32 = vsel %vm5_vm0, %v625_v28, %v624_v25  ;;  %v629_v34 = vld [vmem:[%s1300_s0 + $0x39] sm:$0x2]  }
   0x8   :  { %v623_v24 = vld [vmem:[%s1300_s0 + $0x79] sm:$0x8]   ;;  %v80_v27 = vsel %vm9_vm1, %v622_v21, %v76_v23  ;;  %v627_v30 = vld [vmem:[%s1300_s0 + $0x78] sm:$0x8]   ;;  %v630_v35 = vld [vmem:[%s1300_s0 + $0x58] sm:$0x4]   ;;  %v98_v36 = vsel %vm9_vm1, %v626_v29, %v94_v32  ;;  %v112_v37 = vsel %vm5_vm0, %v629_v34, %v628_v33 }
   0x9   :  { %v84_v31 = vsel %vm13_vm2, %v623_v24, %v80_v27  ;;  %v631_v38 = vld [vmem:[%s1300_s0 + $0x77] sm:$0x8]   ;;  %v632_v39 = vld [vmem:[%s1300_s0 + $0x19] sm:$0x1]   ;;  %v102_v40 = vsel %vm13_vm2, %v627_v30, %v98_v36  ;;  %v116_v41 = vsel %vm9_vm1, %v630_v35, %v112_v37  ;;  %v636_v47 = vld [vmem:[%s1300_s0 + $0x18] sm:$0x1]  }
   0xa   :  { %49 = vrot.lane.b32.xlu0 %v48_v26, %s768_s25  ;;  %85 = vrot.lane.b32.xlu1 %v84_v31, %s769_s30  ;;  %v633_v42 = vld [vmem:[%s1300_s0 + $0x38] sm:$0x2]   ;;  %v120_v45 = vsel %vm13_vm2, %v631_v38, %v116_v41  ;;  %v637_v48 = vld [vmem:[%s1300_s0 + $0x37] sm:$0x2]   ;;  %s770_s18 = smov 108   ;;  %s771_s23 = smov 104  }
   0xb   :  { %v634_v43 = vld [vmem:[%s1300_s0 + $0x57] sm:$0x4]   ;;  %v130_v46 = vsel %vm5_vm0, %v633_v42, %v632_v39  ;;  %v638_v49 = vld [vmem:[%s1300_s0 + $0x56] sm:$0x4]   ;;  %v148_v51 = vsel %vm5_vm0, %v637_v48, %v636_v47  ;;  %v640_v53 = vld [vmem:[%s1300_s0 + $0x17] sm:$0x1]  }
   0xc   :  { %v635_v44 = vld [vmem:[%s1300_s0 + $0x76] sm:$0x8]   ;;  %v134_v50 = vsel %vm9_vm1, %v634_v43, %v130_v46  ;;  %v639_v52 = vld [vmem:[%s1300_s0 + $0x75] sm:$0x8]   ;;  %v152_v54 = vsel %vm9_vm1, %v638_v49, %v148_v51  ;;  %v641_v55 = vld [vmem:[%s1300_s0 + $0x36] sm:$0x2]  }
   0xd   :  { %v642_v56 = vld [vmem:[%s1300_s0 + $0x55] sm:$0x4]   ;;  %v138_v57 = vsel %vm13_vm2, %v635_v44, %v134_v50  ;;  %v166_v58 = vsel %vm5_vm0, %v641_v55, %v640_v53  ;;  %v644_v59 = vld [vmem:[%s1300_s0 + $0x16] sm:$0x1]   ;;  %v156_v62 = vsel %vm13_vm2, %v639_v52, %v152_v54  ;;  %v648_v2 = vld [vmem:[%s1300_s0 + $0x15] sm:$0x1]  }
   0xe   :  { %103 = vrot.lane.b32.xlu0 %v102_v40, %s770_s18  ;;  %121 = vrot.lane.b32.xlu1 %v120_v45, %s771_s23  ;;  %v645_v60 = vld [vmem:[%s1300_s0 + $0x35] sm:$0x2]   ;;  %v170_v63 = vsel %vm9_vm1, %v642_v56, %v166_v58  ;;  %v643_v0 = vld [vmem:[%s1300_s0 + $0x74] sm:$0x8]   ;;  %s772_s11 = smov 100   ;;  %s773_s18 = smov 96  }
   0xf   :  { %v646_v61 = vld [vmem:[%s1300_s0 + $0x54] sm:$0x4]   ;;  %v184_v1 = vsel %vm5_vm0, %v645_v60, %v644_v59  ;;  %v649_v5 = vld [vmem:[%s1300_s0 + $0x34] sm:$0x2]   ;;  %v652_v8 = vld [vmem:[%s1300_s0 + $0x14] sm:$0x1]   ;;  %v174_v11 = vsel %vm13_vm2, %v643_v0, %v170_v63 }
  0x10   :  { %v188_v3 = vsel %vm9_vm1, %v646_v61, %v184_v1  ;;  %v647_v4 = vld [vmem:[%s1300_s0 + $0x73] sm:$0x8]   ;;  %v650_v6 = vld [vmem:[%s1300_s0 + $0x53] sm:$0x4]   ;;  %v202_v7 = vsel %vm5_vm0, %v649_v5, %v648_v2  ;;  %v653_v9 = vld [vmem:[%s1300_s0 + $0x33] sm:$0x2]  }
  0x11   :  { %v654_v10 = vld [vmem:[%s1300_s0 + $0x52] sm:$0x4]   ;;  %v220_v12 = vsel %vm5_vm0, %v653_v9, %v652_v8  ;;  %v656_v13 = vld [vmem:[%s1300_s0 + $0x13] sm:$0x1]   ;;  %v192_v14 = vsel %vm13_vm2, %v647_v4, %v188_v3  ;;  %v206_v15 = vsel %vm9_vm1, %v650_v6, %v202_v7  ;;  %v651_v16 = vld [vmem:[%s1300_s0 + $0x72] sm:$0x8]  }
  0x12   :  { %139 = vrot.lane.b32.xlu0 %v138_v57, %s772_s11  ;;  %157 = vrot.lane.b32.xlu1 %v156_v62, %s773_s18  ;;  %v655_v17 = vld [vmem:[%s1300_s0 + $0x71] sm:$0x8]   ;;  %v657_v18 = vld [vmem:[%s1300_s0 + $0x32] sm:$0x2]   ;;  %v224_v19 = vsel %vm9_vm1, %v654_v10, %v220_v12  ;;  %s774_s4 = smov 92   ;;  %s775_s9 = smov 88   ;;  %v210_v27 = vsel %vm13_vm2, %v651_v16, %v206_v15 }
  0x13   :  { %v238_v20 = vsel %vm5_vm0, %v657_v18, %v656_v13  ;;  %v658_v21 = vld [vmem:[%s1300_s0 + $0x51] sm:$0x4]   ;;  %v660_v22 = vld [vmem:[%s1300_s0 + $0x12] sm:$0x1]   ;;  %v664_v26 = vld [vmem:[%s1300_s0 + $0x11] sm:$0x1]   ;;  %v228_v29 = vsel %vm13_vm2, %v655_v17, %v224_v19 }
  0x14   :  { %v661_v23 = vld [vmem:[%s1300_s0 + $0x31] sm:$0x2]   ;;  %v665_v28 = vld [vmem:[%s1300_s0 + $0x30] sm:$0x2]   ;;  %v242_v30 = vsel %vm9_vm1, %v658_v21, %v238_v20  ;;  %v659_v31 = vld [vmem:[%s1300_s0 + $0x70] sm:$0x8]  }
  0x15   :  { %v256_v24 = vsel %vm5_vm0, %v661_v23, %v660_v22  ;;  %v662_v25 = vld [vmem:[%s1300_s0 + $0x50] sm:$0x4]   ;;  %v668_v32 = vld [vmem:[%s1300_s0 + $0x10] sm:$0x1]   ;;  %v274_v36 = vsel %vm5_vm0, %v665_v28, %v664_v26  ;;  %v666_v37 = vld [vmem:[%s1300_s0 + $0x4f] sm:$0x4]   ;;  %v246_v42 = vsel %vm13_vm2, %v659_v31, %v242_v30 }
  0x16   :  { %175 = vrot.lane.b32.xlu0 %v174_v11, %s774_s4  ;;  %193 = vrot.lane.b32.xlu1 %v192_v14, %s775_s9  ;;  %v669_v33 = vld [vmem:[%s1300_s0 + $0x2f] sm:$0x2]   ;;  %v260_v34 = vsel %vm9_vm1, %v662_v25, %v256_v24  ;;  %v663_v35 = vld [vmem:[%s1300_s0 + $0x6f] sm:$0x8]   ;;  %s776_s22 = smov 84   ;;  %s777_s29 = smov 80   ;;  %v278_v46 = vsel %vm9_vm1, %v666_v37, %v274_v36 }
  0x17   :  { %v292_v38 = vsel %vm5_vm0, %v669_v33, %v668_v32  ;;  %v670_v39 = vld [vmem:[%s1300_s0 + $0x4e] sm:$0x4]   ;;  %v672_v40 = vld [vmem:[%s1300_s0 + $0xf] sm:$0x1]   ;;  %v676_v43 = vld [vmem:[%s1300_s0 + $0xe] sm:$0x1]   ;;  %v264_v45 = vsel %vm13_vm2, %v663_v35, %v260_v34 }
  0x18   :  { %v673_v41 = vld [vmem:[%s1300_s0 + $0x2e] sm:$0x2]   ;;  %v677_v44 = vld [vmem:[%s1300_s0 + $0x2d] sm:$0x2]   ;;  %v667_v47 = vld [vmem:[%s1300_s0 + $0x6e] sm:$0x8]   ;;  %v296_v48 = vsel %vm9_vm1, %v670_v39, %v292_v38 }
  0x19   :  { %v671_v49 = vld [vmem:[%s1300_s0 + $0x6d] sm:$0x8]   ;;  %v310_v50 = vsel %vm5_vm0, %v673_v41, %v672_v40  ;;  %v674_v51 = vld [vmem:[%s1300_s0 + $0x4d] sm:$0x4]   ;;  %s778_s11 = smov 76   ;;  %v328_v52 = vsel %vm5_vm0, %v677_v44, %v676_v43  ;;  %s779_s18 = smov 72   ;;  %v282_v56 = vsel %vm13_vm2, %v667_v47, %v278_v46 }
  0x1a   :  { %211 = vrot.lane.b32.xlu0 %v210_v27, %s776_s22  ;;  %229 = vrot.lane.b32.xlu1 %v228_v29, %s777_s29  ;;  %v678_v53 = vld [vmem:[%s1300_s0 + $0x4c] sm:$0x4]   ;;  %v680_v54 = vld [vmem:[%s1300_s0 + $0xd] sm:$0x1]   ;;  %v300_v59 = vsel %vm13_vm2, %v671_v49, %v296_v48  ;;  %v314_v60 = vsel %vm9_vm1, %v674_v51, %v310_v50  ;;  %s780_s29 = smov 68   ;;  %s781_s7 = smov 64  }
  0x1b   :  { %v681_v55 = vld [vmem:[%s1300_s0 + $0x2c] sm:$0x2]   ;;  %v684_v57 = vld [vmem:[%s1300_s0 + $0xc] sm:$0x1]   ;;  %v675_v61 = vld [vmem:[%s1300_s0 + $0x6c] sm:$0x8]   ;;  %v332_v62 = vsel %vm9_vm1, %v678_v53, %v328_v52 }
  0x1c   :  { %v685_v58 = vld [vmem:[%s1300_s0 + $0x2b] sm:$0x2]   ;;  %v679_v63 = vld [vmem:[%s1300_s0 + $0x6b] sm:$0x8]   ;;  %v346_v0 = vsel %vm5_vm0, %v681_v55, %v680_v54  ;;  %v682_v1 = vld [vmem:[%s1300_s0 + $0x4b] sm:$0x4]   ;;  %v318_v6 = vsel %vm13_vm2, %v675_v61, %v314_v60 }
  0x1d   :  { %v364_v2 = vsel %vm5_vm0, %v685_v58, %v684_v57  ;;  %v686_v3 = vld [vmem:[%s1300_s0 + $0x4a] sm:$0x4]   ;;  %v688_v4 = vld [vmem:[%s1300_s0 + $0xb] sm:$0x1]   ;;  %v692_v7 = vld [vmem:[%s1300_s0 + $0xa] sm:$0x1]   ;;  %v336_v9 = vsel %vm13_vm2, %v679_v63, %v332_v62  ;;  %v350_v10 = vsel %vm9_vm1, %v682_v1, %v346_v0 }
  0x1e   :  { %247 = vrot.lane.b32.xlu0 %v246_v42, %s778_s11  ;;  %265 = vrot.lane.b32.xlu1 %v264_v45, %s779_s18  ;;  %v689_v5 = vld [vmem:[%s1300_s0 + $0x2a] sm:$0x2]   ;;  %v693_v8 = vld [vmem:[%s1300_s0 + $0x29] sm:$0x2]   ;;  %v368_v12 = vsel %vm9_vm1, %v686_v3, %v364_v2  ;;  %s782_s18 = smov 60   ;;  %s783_s25 = smov 56  }
  0x1f   :  { %v683_v11 = vld [vmem:[%s1300_s0 + $0x6a] sm:$0x8]   ;;  %v687_v13 = vld [vmem:[%s1300_s0 + $0x69] sm:$0x8]   ;;  %v382_v14 = vsel %vm5_vm0, %v689_v5, %v688_v4  ;;  %v690_v15 = vld [vmem:[%s1300_s0 + $0x49] sm:$0x4]   ;;  %v400_v16 = vsel %vm5_vm0, %v693_v8, %v692_v7 }
  0x20   :  { %v694_v17 = vld [vmem:[%s1300_s0 + $0x48] sm:$0x4]   ;;  %v696_v18 = vld [vmem:[%s1300_s0 + $0x9] sm:$0x1]   ;;  %v354_v20 = vsel %vm13_vm2, %v683_v11, %v350_v10  ;;  %v700_v21 = vld [vmem:[%s1300_s0 + $0x8] sm:$0x1]   ;;  %v372_v23 = vsel %vm13_vm2, %v687_v13, %v368_v12  ;;  %v386_v24 = vsel %vm9_vm1, %v690_v15, %v382_v14 }
  0x21   :  { %v697_v19 = vld [vmem:[%s1300_s0 + $0x28] sm:$0x2]   ;;  %v701_v22 = vld [vmem:[%s1300_s0 + $0x27] sm:$0x2]   ;;  %v691_v25 = vld [vmem:[%s1300_s0 + $0x68] sm:$0x8]   ;;  %v404_v26 = vsel %vm9_vm1, %v694_v17, %v400_v16 }
  0x22   :  { %283 = vrot.lane.b32.xlu0 %v282_v56, %s780_s29  ;;  %301 = vrot.lane.b32.xlu1 %v300_v59, %s781_s7  ;;  %v695_v27 = vld [vmem:[%s1300_s0 + $0x67] sm:$0x8]   ;;  %v418_v28 = vsel %vm5_vm0, %v697_v19, %v696_v18  ;;  %v698_v29 = vld [vmem:[%s1300_s0 + $0x47] sm:$0x4]   ;;  %s784_s7 = smov 52   ;;  %v436_v30 = vsel %vm5_vm0, %v701_v22, %v700_v21  ;;  %s785_s14 = smov 48   ;;  %v390_v34 = vsel %vm13_vm2, %v691_v25, %v386_v24 }
  0x23   :  { %v702_v31 = vld [vmem:[%s1300_s0 + $0x46] sm:$0x4]   ;;  %v704_v32 = vld [vmem:[%s1300_s0 + $0x7] sm:$0x1]   ;;  %v708_v35 = vld [vmem:[%s1300_s0 + $0x6] sm:$0x1]   ;;  %v408_v37 = vsel %vm13_vm2, %v695_v27, %v404_v26  ;;  %v422_v38 = vsel %vm9_vm1, %v698_v29, %v418_v28 }
  0x24   :  { %v705_v33 = vld [vmem:[%s1300_s0 + $0x26] sm:$0x2]   ;;  %v709_v36 = vld [vmem:[%s1300_s0 + $0x25] sm:$0x2]   ;;  %v699_v39 = vld [vmem:[%s1300_s0 + $0x66] sm:$0x8]   ;;  %v440_v40 = vsel %vm9_vm1, %v702_v31, %v436_v30 }
  0x25   :  { %v703_v41 = vld [vmem:[%s1300_s0 + $0x65] sm:$0x8]   ;;  %v454_v42 = vsel %vm5_vm0, %v705_v33, %v704_v32  ;;  %v706_v43 = vld [vmem:[%s1300_s0 + $0x45] sm:$0x4]   ;;  %v472_v45 = vsel %vm5_vm0, %v709_v36, %v708_v35  ;;  %v710_v46 = vld [vmem:[%s1300_s0 + $0x44] sm:$0x4]   ;;  %v426_v49 = vsel %vm13_vm2, %v699_v39, %v422_v38 }
  0x26   :  { %319 = vrot.lane.b32.xlu0 %v318_v6, %s782_s18  ;;  %337 = vrot.lane.b32.xlu1 %v336_v9, %s783_s25  ;;  %s786_s25 = smov 44   ;;  %v707_v44 = vld [vmem:[%s1300_s0 + $0x64] sm:$0x8]   ;;  %v712_v47 = vld [vmem:[%s1300_s0 + $0x5] sm:$0x1]   ;;  %s787_s5 = smov 40   ;;  %v444_v53 = vsel %vm13_vm2, %v703_v41, %v440_v40  ;;  %v458_v54 = vsel %vm9_vm1, %v706_v43, %v454_v42  ;;  %v476_v58 = vsel %vm9_vm1, %v710_v46, %v472_v45 }
  0x27   :  { %v713_v48 = vld [vmem:[%s1300_s0 + $0x24] sm:$0x2]   ;;  %v711_v50 = vld [vmem:[%s1300_s0 + $0x63] sm:$0x8]   ;;  %v716_v51 = vld [vmem:[%s1300_s0 + $0x4] sm:$0x1]   ;;  %v462_v3 = vsel %vm13_vm2, %v707_v44, %v458_v54 }
  0x28   :  { %v717_v52 = vld [vmem:[%s1300_s0 + $0x23] sm:$0x2]   ;;  %v714_v55 = vld [vmem:[%s1300_s0 + $0x43] sm:$0x4]   ;;  %v606_v57 = vld [vmem:[%s1300_s0 + $0x3e] sm:$0x4]   ;;  %v490_v59 = vsel %vm5_vm0, %v713_v48, %v712_v47  ;;  %v480_v7 = vsel %vm13_vm2, %v711_v50, %v476_v58 }
  0x29   :  { %v718_v56 = vld [vmem:[%s1300_s0 + $0x42] sm:$0x4]   ;;  %v607_v60 = vld [vmem:[%s1300_s0 + $0x5d] sm:$0x8]   ;;  %s788_s24 = smov 36   ;;  %v508_v63 = vsel %vm5_vm0, %v717_v52, %v716_v51  ;;  %s789_s29 = smov 32   ;;  %v494_v8 = vsel %vm9_vm1, %v714_v55, %v490_v59 }
  0x2a   :  { %355 = vrot.lane.b32.xlu0 %v354_v20, %s784_s7  ;;  %373 = vrot.lane.b32.xlu1 %v372_v23, %s785_s14  ;;  %v2_v61 = vld [vmem:[%s1300_s0] sm:$0x1]   ;;  %v720_v0 = vld [vmem:[%s1300_s0 + $0x3] sm:$0x1]   ;;  %v512_v11 = vsel %vm9_vm1, %v718_v56, %v508_v63  ;;  %s790_s11 = smov 28   ;;  %s791_s18 = smov 24  }
  0x2b   :  { %v605_v62 = vld [vmem:[%s1300_s0 + $0x1f] sm:$0x2]   ;;  %v721_v1 = vld [vmem:[%s1300_s0 + $0x22] sm:$0x2]   ;;  %v724_v4 = vld [vmem:[%s1300_s0 + $0x2] sm:$0x1]  }
  0x2c   :  { %v6_v2 = vsel %vm5_vm0, %v605_v62, %v2_v61  ;;  %v725_v5 = vld [vmem:[%s1300_s0 + $0x21] sm:$0x2]   ;;  %v715_v9 = vld [vmem:[%s1300_s0 + $0x62] sm:$0x8]   ;;  %v719_v12 = vld [vmem:[%s1300_s0 + $0x61] sm:$0x8]   ;;  %v526_v13 = vsel %vm5_vm0, %v721_v1, %v720_v0 }
  0x2d   :  { %v10_v6 = vsel %vm9_vm1, %v606_v57, %v6_v2  ;;  %v722_v14 = vld [vmem:[%s1300_s0 + $0x41] sm:$0x4]   ;;  %v544_v15 = vsel %vm5_vm0, %v725_v5, %v724_v4  ;;  %v726_v16 = vld [vmem:[%s1300_s0 + $0x40] sm:$0x4]   ;;  %v728_v17 = vld [vmem:[%s1300_s0 + $0x1] sm:$0x1]   ;;  %v498_v19 = vsel %vm13_vm2, %v715_v9, %v494_v8  ;;  %v516_v20 = vsel %vm13_vm2, %v719_v12, %v512_v11 }
  0x2e   :  { %391 = vrot.lane.b32.xlu0 %v390_v34, %s786_s25  ;;  %409 = vrot.lane.b32.xlu1 %v408_v37, %s787_s5  ;;  %v14_v10 = vsel %vm13_vm2, %v607_v60, %v10_v6  ;;  %v729_v18 = vld [vmem:[%s1300_s0 + $0x20] sm:$0x2]   ;;  %v530_v21 = vsel %vm9_vm1, %v722_v14, %v526_v13  ;;  %v723_v22 = vld [vmem:[%s1300_s0 + $0x60] sm:$0x8]   ;;  %v548_v23 = vsel %vm9_vm1, %v726_v16, %v544_v15  ;;  %s792_s25 = smov 20   ;;  %s793_s26 = smov 16  }
  0x2f   :  { %16 = vst.msk [vmem:[#allocation0] ss:$8 sm:$0xf] %vm15_vm3, %v14_v10   ;;  %v727_v24 = vld [vmem:[%s1300_s0 + $0x5f] sm:$0x8]   ;;  %v562_v25 = vsel %vm5_vm0, %v729_v18, %v728_v17  ;;  %v534_v27 = vsel %vm13_vm2, %v723_v22, %v530_v21  ;;  %s796_s30 = smov 4  }
  0x30   :  { %v730_v26 = vld [vmem:[%s1300_s0 + $0x3f] sm:$0x4]   ;;  %v552_v28 = vsel %vm13_vm2, %v727_v24, %v548_v23  ;;  %vm33_vm4 = vcmask 1048544   ;;  %vm51_vm5 = vcmask 1015744   ;;  %vm69_vm6 = vcmask 982944  }
  0x31   :  { %v566_v29 = vsel %vm9_vm1, %v730_v26, %v562_v25  ;;  %v731_v30 = vld [vmem:[%s1300_s0 + $0x5e] sm:$0x8]   ;;  %s794_s0 = smov 12   ;;  %vm87_vm7 = vcmask 950144   ;;  %vm105_vm8 = vcmask 917344   ;;  %vm123_vm9 = vcmask 884544  }
  0x32   :  { %427 = vrot.lane.b32.xlu0 %v426_v49, %s788_s24  ;;  %445 = vrot.lane.b32.xlu1 %v444_v53, %s789_s29  ;;  %s795_s29 = smov 8   ;;  %v570_v31 = vsel %vm13_vm2, %v731_v30, %v566_v29  ;;  %vm141_vm10 = vcmask 851744   ;;  %vm159_vm11 = vcmask 818944   ;;  %vm177_vm12 = vcmask 786144  }
  0x33   :  { %vm195_vm13 = vcmask 753344   ;;  %vm213_vm14 = vcmask 720544   ;;  %vm231_vm15 = vcmask 687744   ;;  %vm249_vm0 = vcmask 654944  }
  0x34   :  { %vm267_vm1 = vcmask 622144   ;;  %vm285_vm2 = vcmask 589344   ;;  %vm303_vm3 = vcmask 556544  }
  0x36   :  { %463 = vrot.lane.b32.xlu0 %v462_v3, %s790_s11  ;;  %481 = vrot.lane.b32.xlu1 %v480_v7, %s791_s18 }
  0x3a   :  { %499 = vrot.lane.b32.xlu0 %v498_v19, %s792_s25  ;;  %517 = vrot.lane.b32.xlu1 %v516_v20, %s793_s26 }
  0x3e   :  { %535 = vrot.lane.b32.xlu0 %v534_v27, %s794_s0  ;;  %553 = vrot.lane.b32.xlu1 %v552_v28, %s795_s29 }
  0x42   :  { %571 = vrot.lane.b32.xlu0 %v570_v31, %s796_s30 }
  0x78   :  { %v32_v32 = vpop.permute.xlu0 %31   ;;  %v68_v33 = vpop.permute.xlu1 %67  }
  0x79   :  { %34 = vst.msk [vmem:[#allocation0] ss:$8 sm:$0xf] %vm33_vm4, %v32_v32   ;;  %vm321_vm4 = vcmask 523744  }
  0x7c   :  { %v50_v34 = vpop.permute.xlu0 %49   ;;  %v86_v35 = vpop.permute.xlu1 %85  }
  0x7d   :  { %52 = vst.msk [vmem:[#allocation0] ss:$8 sm:$0xf] %vm51_vm5, %v50_v34   ;;  %vm339_vm5 = vcmask 490944  }
  0x7e   :  { %70 = vst.msk [vmem:[#allocation0] ss:$8 sm:$0xf] %vm69_vm6, %v68_v33   ;;  %vm357_vm6 = vcmask 458144  }
  0x7f   :  { %88 = vst.msk [vmem:[#allocation0] ss:$8 sm:$0xf] %vm87_vm7, %v86_v35   ;;  %vm375_vm7 = vcmask 425344  }
  0x80   :  { %v104_v36 = vpop.permute.xlu0 %103   ;;  %v122_v37 = vpop.permute.xlu1 %121  }
  0x81   :  { %106 = vst.msk [vmem:[#allocation0] ss:$8 sm:$0xf] %vm105_vm8, %v104_v36   ;;  %vm393_vm8 = vcmask 392544  }
  0x82   :  { %124 = vst.msk [vmem:[#allocation0] ss:$8 sm:$0xf] %vm123_vm9, %v122_v37   ;;  %vm411_vm9 = vcmask 359744  }
  0x84   :  { %v140_v38 = vpop.permute.xlu0 %139   ;;  %v158_v39 = vpop.permute.xlu1 %157  }
  0x85   :  { %142 = vst.msk [vmem:[#allocation0] ss:$8 sm:$0xf] %vm141_vm10, %v140_v38   ;;  %vm429_vm10 = vcmask 326944  }
  0x86   :  { %160 = vst.msk [vmem:[#allocation0] ss:$8 sm:$0xf] %vm159_vm11, %v158_v39   ;;  %vm447_vm11 = vcmask 294144  }
  0x88   :  { %v176_v40 = vpop.permute.xlu0 %175   ;;  %v194_v41 = vpop.permute.xlu1 %193  }
  0x89   :  { %178 = vst.msk [vmem:[#allocation0] ss:$8 sm:$0xf] %vm177_vm12, %v176_v40   ;;  %vm465_vm12 = vcmask 261344  }
  0x8a   :  { %196 = vst.msk [vmem:[#allocation0] ss:$8 sm:$0xf] %vm195_vm13, %v194_v41   ;;  %vm483_vm13 = vcmask 228544  }
  0x8c   :  { %v212_v42 = vpop.permute.xlu0 %211   ;;  %v230_v43 = vpop.permute.xlu1 %229  }
  0x8d   :  { %214 = vst.msk [vmem:[#allocation0] ss:$8 sm:$0xf] %vm213_vm14, %v212_v42   ;;  %vm501_vm14 = vcmask 195744  }
  0x8e   :  { %232 = vst.msk [vmem:[#allocation0] ss:$8 sm:$0xf] %vm231_vm15, %v230_v43   ;;  %vm519_vm15 = vcmask 162944  }
  0x90   :  { %v248_v44 = vpop.permute.xlu0 %247   ;;  %v266_v45 = vpop.permute.xlu1 %265  }
  0x91   :  { %250 = vst.msk [vmem:[#allocation0] ss:$8 sm:$0xf] %vm249_vm0, %v248_v44   ;;  %vm537_vm0 = vcmask 130144  }
  0x92   :  { %268 = vst.msk [vmem:[#allocation0] ss:$8 sm:$0xf] %vm267_vm1, %v266_v45   ;;  %vm555_vm1 = vcmask 97344  }
  0x94   :  { %v284_v46 = vpop.permute.xlu0 %283   ;;  %v302_v47 = vpop.permute.xlu1 %301  }
  0x95   :  { %286 = vst.msk [vmem:[#allocation0] ss:$8 sm:$0xf] %vm285_vm2, %v284_v46   ;;  %vm573_vm2 = vcmask 64544  }
  0x96   :  { %304 = vst.msk [vmem:[#allocation0] ss:$8 sm:$0xf] %vm303_vm3, %v302_v47  }
  0x98   :  { %v320_v48 = vpop.permute.xlu0 %319   ;;  %v338_v49 = vpop.permute.xlu1 %337  }
  0x99   :  { %322 = vst.msk [vmem:[#allocation0] ss:$8 sm:$0xf] %vm321_vm4, %v320_v48  }
  0x9a   :  { %340 = vst.msk [vmem:[#allocation0] ss:$8 sm:$0xf] %vm339_vm5, %v338_v49  }
  0x9c   :  { %v356_v50 = vpop.permute.xlu0 %355   ;;  %v374_v51 = vpop.permute.xlu1 %373  }
  0x9d   :  { %358 = vst.msk [vmem:[#allocation0] ss:$8 sm:$0xf] %vm357_vm6, %v356_v50  }
  0x9e   :  { %376 = vst.msk [vmem:[#allocation0] ss:$8 sm:$0xf] %vm375_vm7, %v374_v51  }
  0xa0   :  { %v392_v52 = vpop.permute.xlu0 %391   ;;  %v410_v53 = vpop.permute.xlu1 %409  }
  0xa1   :  { %394 = vst.msk [vmem:[#allocation0] ss:$8 sm:$0xf] %vm393_vm8, %v392_v52  }
  0xa2   :  { %412 = vst.msk [vmem:[#allocation0] ss:$8 sm:$0xf] %vm411_vm9, %v410_v53  }
  0xa4   :  { %v428_v54 = vpop.permute.xlu0 %427   ;;  %v446_v55 = vpop.permute.xlu1 %445  }
  0xa5   :  { %430 = vst.msk [vmem:[#allocation0] ss:$8 sm:$0xf] %vm429_vm10, %v428_v54  }
  0xa6   :  { %448 = vst.msk [vmem:[#allocation0] ss:$8 sm:$0xf] %vm447_vm11, %v446_v55  }
  0xa8   :  { %v464_v56 = vpop.permute.xlu0 %463   ;;  %v482_v57 = vpop.permute.xlu1 %481  }
  0xa9   :  { %466 = vst.msk [vmem:[#allocation0] ss:$8 sm:$0xf] %vm465_vm12, %v464_v56  }
  0xaa   :  { %484 = vst.msk [vmem:[#allocation0] ss:$8 sm:$0xf] %vm483_vm13, %v482_v57  }
  0xac   :  { %v500_v58 = vpop.permute.xlu0 %499   ;;  %v518_v59 = vpop.permute.xlu1 %517  }
  0xad   :  { %502 = vst.msk [vmem:[#allocation0] ss:$8 sm:$0xf] %vm501_vm14, %v500_v58  }
  0xae   :  { %520 = vst.msk [vmem:[#allocation0] ss:$8 sm:$0xf] %vm519_vm15, %v518_v59  }
  0xb0   :  { %v536_v60 = vpop.permute.xlu0 %535   ;;  %v554_v61 = vpop.permute.xlu1 %553  }
  0xb1   :  { %538 = vst.msk [vmem:[#allocation0] ss:$8 sm:$0xf] %vm537_vm0, %v536_v60  }
  0xb2   :  { %556 = vst.msk [vmem:[#allocation0] ss:$8 sm:$0xf] %vm555_vm1, %v554_v61  }
  0xb4   :  { %v572_v62 = vpop.permute.xlu0 %571  }
  0xb5   :  { %574 = vst.msk [vmem:[#allocation0] ss:$8 sm:$0xf] %vm573_vm2, %v572_v62  }
  0xbc   :  { %v579_v63 = vld [vmem:[#allocation0] sm:$0x1]  ;;  %v584_v0 = vld [vmem:[#allocation0 + $0x8] sm:$0x1]  ;;  %v590_v1 = vld [vmem:[#allocation0 + $0x10] sm:$0x1] }
  0xbd   :  { %582 = vst [vmem:[%s1301_s1] sm:$0x1] %v579_v63  ;;  %732 = vst [vmem:[%s1301_s1 + $0x1] sm:$0x1] %v584_v0  ;;  %v597_v2 = vld [vmem:[#allocation0 + $0x18] sm:$0x1] }
  0xbe   :  { %733 = vst [vmem:[%s1301_s1 + $0x2] sm:$0x1] %v590_v1  ;;  %734 = vst [vmem:[%s1301_s1 + $0x3] sm:$0x1] %v597_v2 }

// kernel: node_bridge_forward.1
= control target key start
LH: loop header
LB: loop body
LE: loop exit
PB: predicated region body
PF: predicated region fallthrough
CT: control target
= control target key end

     0   :  { %v17_v0 = vlaneseq  ;;  %s91_s1 = inlined_call_operand.vmem [shape: f32[1,512], index: 1, kind: input, shape index: {}]   ;;  %s92_s0 = inlined_call_operand.vmem [shape: f32[8,512], index: 0, kind: input, shape index: {}]   ;;  %s93_s2 = inlined_call_operand.vmem [shape: f32[8,512], index: 2, kind: output, shape index: {}]  }
   0x1   :  { %v15_v2 = vld [vmem:[%s91_s1] sm:$0xf]  ;;  %v12_v8 = vld [vmem:[%s92_s0 + $0x8] sm:$0xff]  ;;  %v13_v9 = vld [vmem:[%s92_s0 + $0x10] sm:$0xff] }
   0x2   :  { %v18_v1 = vshrl.u32 %v17_v0, 7  ;;  %v11_v3 = vld [vmem:[%s92_s0] sm:$0xff]  ;;  %v14_v10 = vld [vmem:[%s92_s0 + $0x18] sm:$0xff] }
   0x4   :  { %v19_v4 = vsub.s32 0, %v18_v1  ;;  %v23_v5 = vsub.s32 1, %v18_v1  ;;  %v27_v6 = vsub.s32 2, %v18_v1  ;;  %v31_v7 = vsub.s32 3, %v18_v1 }
   0x6   :  { %v20_v11 = vrot.slane %v15_v2, %v19_v4  ;;  %v24_v12 = vrot.slane %v15_v2, %v23_v5  ;;  %v28_v13 = vrot.slane %v15_v2, %v27_v6  ;;  %v32_v14 = vrot.slane %v15_v2, %v31_v7 }
   0x8   :  { %v37_v15 = vmul.f32 %v20_v11, %v11_v3  ;;  %v38_v16 = vmul.f32 %v24_v12, %v12_v8  ;;  %v39_v17 = vmul.f32 %v28_v13, %v13_v9  ;;  %v40_v18 = vmul.f32 %v32_v14, %v14_v10 }
   0xa   :  { %41 = vst [vmem:[%s93_s2] sm:$0xff] %v37_v15  ;;  %42 = vst [vmem:[%s93_s2 + $0x8] sm:$0xff] %v38_v16 }
   0xb   :  { %43 = vst [vmem:[%s93_s2 + $0x10] sm:$0xff] %v39_v17  ;;  %44 = vst [vmem:[%s93_s2 + $0x18] sm:$0xff] %v40_v18 }

</bundles_post_ra>
